<compile_context>
chip_gen: v6e
topology: v6e:2x2x1
jax: 0.10.0
libtpu: 0.0.40
codegen_flags: <defaults>
</compile_context>

<pallas_src>
import functools

import jax
import jax.numpy as jnp
from jax.experimental import pallas as pl
from jax.experimental.pallas import tpu as pltpu


def _round_up(x, m):
    return ((x + m - 1) // m) * m


def _ffn_fused_kernel(*refs, n_layers):
    # refs = (x_ref, w0, b0, w1, b1, ..., w_{L-1}, b_{L-1}, alpha_ref, o_ref)
    x_ref = refs[0]
    alpha_ref = refs[1 + 2 * n_layers]
    o_ref = refs[2 + 2 * n_layers]

    a = alpha_ref[0]          # PReLU slope: read once per grid step from SMEM
    h = x_ref[...]            # (tile_n, K_pad) bf16 row tile
    y = None
    for layer in range(n_layers):          # static unroll (n_layers is small)
        w_ref = refs[1 + 2 * layer]        # (K_pad, M_pad) bf16, VMEM-resident
        b_ref = refs[2 + 2 * layer]        # (1, M_pad) f32,  VMEM-resident
        # bf16 MXU matmul with f32 accumulation.
        y = jnp.dot(h, w_ref[...], preferred_element_type=jnp.float32)
        y = y + b_ref[...]                 # bias broadcast over rows (f32)
        if layer < n_layers - 1:
            y = jnp.where(y > 0, y, a * y)         # PReLU in f32 (VPU)
            # dropout in eval mode -> identity
            h = y.astype(jnp.bfloat16)             # feed next MXU pass in bf16
    o_ref[...] = y.astype(o_ref.dtype)


def _pick_tile_n(N, dims_p, vmem_budget_bytes=16 << 20):
    """Largest row tile (multiple of 8) whose activations fit the budget."""
    per_row = (
        dims_p[0] * 2 * 2          # bf16 x tile, double-buffered
        + dims_p[-1] * 4 * 2       # f32 out tile, double-buffered
        + max(dims_p) * 4 * 2      # f32 intermediate activations (scratch)
    )
    t = (vmem_budget_bytes // max(per_row, 1)) // 8 * 8
    t = max(8, min(1024, t))
    return min(t, _round_up(N, 8))


def feedforward_net(x, params, alpha, *, tile_n=None):
    """Fused multi-layer Linear(+PReLU) forward.  x:(N, in_feats) f32."""
    n_layers = len(params)
    N, in_feats = x.shape
    out_feats = params[-1][0].shape[1]

    # Lane-dense padding: every feature dim -> multiple of 128.
    dims = [in_feats] + [w.shape[1] for (w, _) in params]
    dims_p = [_round_up(d, 128) for d in dims]

    if tile_n is None:
        tile_n = _pick_tile_n(N, dims_p)
    N_pad = _round_up(N, tile_n)

    # Pad + cast the activations to bf16 (MXU operand dtype).
    x_p = jnp.zeros((N_pad, dims_p[0]), jnp.bfloat16)
    x_p = x_p.at[:N, :in_feats].set(x.astype(jnp.bfloat16))

    flat_args = [x_p]
    in_specs = [pl.BlockSpec((tile_n, dims_p[0]), lambda i: (i, 0))]  # x row tile
    for li, (w, b) in enumerate(params):
        kin, kout = w.shape
        kin_p, kout_p = dims_p[li], dims_p[li + 1]
        w_p = jnp.zeros((kin_p, kout_p), jnp.bfloat16)
        w_p = w_p.at[:kin, :kout].set(w.astype(jnp.bfloat16))
        b_p = jnp.zeros((1, kout_p), jnp.float32)
        b_p = b_p.at[0, :kout].set(b)
        flat_args += [w_p, b_p]
        # Constant index_map -> weights/biases stay resident in VMEM across
        # the whole row-tile grid (no per-step HBM refetch).
        in_specs += [
            pl.BlockSpec((kin_p, kout_p), lambda i: (0, 0)),
            pl.BlockSpec((1, kout_p), lambda i: (0, 0)),
        ]
    flat_args.append(alpha)
    in_specs.append(pl.BlockSpec(memory_space=pltpu.MemorySpace.SMEM))

    out_p = pl.pallas_call(
        functools.partial(_ffn_fused_kernel, n_layers=n_layers),
        out_shape=jax.ShapeDtypeStruct((N_pad, dims_p[-1]), jnp.float32),
        grid_spec=pltpu.PrefetchScalarGridSpec(
            num_scalar_prefetch=0,
            grid=(N_pad // tile_n,),
            in_specs=in_specs,
            out_specs=pl.BlockSpec((tile_n, dims_p[-1]), lambda i: (i, 0)),
        ),
        compiler_params=pltpu.CompilerParams(
            dimension_semantics=("parallel",)),
    )(*flat_args)

    return out_p[:N, :out_feats]


def init_feedforward_params(key, in_feats, hidden, out_feats, n_layers):
    """Deterministic xavier_uniform(gain=sqrt(2)) weights, zero biases, alpha=0.25."""
    gain = jnp.sqrt(2.0)  # nn.init.calculate_gain('relu')
    if n_layers == 1:
        shapes = [(in_feats, out_feats)]
    else:
        shapes = [(in_feats, hidden)]
        shapes += [(hidden, hidden)] * (n_layers - 2)
        shapes += [(hidden, out_feats)]

    params = []
    for (fan_in, fan_out) in shapes:
        key, sub = jax.random.split(key)
        bound = gain * jnp.sqrt(6.0 / (fan_in + fan_out))
        w = jax.random.uniform(sub, (fan_in, fan_out), jnp.float32,
                               minval=-bound, maxval=bound)
        b = jnp.zeros((fan_out,), jnp.float32)
        params.append((w, b))
    alpha = jnp.array([0.25], jnp.float32)  # nn.PReLU() default
    return params, alpha


def _reference(x, params, alpha):
    """Pure-JAX reference with matching precision (bf16 matmul operands,
    f32 accumulation + f32 bias/PReLU epilogue, eval-mode dropout)."""
    n_layers = len(params)
    h = x.astype(jnp.bfloat16)
    y = None
    for layer_id, (w, b) in enumerate(params):
        y = jnp.dot(h, w.astype(jnp.bfloat16),
                    preferred_element_type=jnp.float32) + b
        if layer_id < n_layers - 1:
            y = jnp.where(y > 0, y, alpha[0] * y)
            h = y.astype(jnp.bfloat16)
    return y.astype(jnp.float32)


if __name__ == "__main__":
    # Small shapes consistent with the module: node-feature matrix (N, in_feats).
    N, in_feats, hidden, out_feats, n_layers, dropout = 128, 32, 64, 16, 3, 0.5

    key = jax.random.PRNGKey(0)
    key, xkey = jax.random.split(key)
    x = jax.random.normal(xkey, (N, in_feats), jnp.float32)

    # --- multi-layer path (Linear -> PReLU -> Dropout(eval) repeated) ---
    params, alpha = init_feedforward_params(key, in_feats, hidden, out_feats,
                                            n_layers)
    out = jax.block_until_ready(feedforward_net(x, params, alpha))
    ref = _reference(x, params, alpha)
    assert out.shape == (N, out_feats)
    assert jnp.allclose(out, ref, atol=1e-3, rtol=1e-3), \
        float(jnp.max(jnp.abs(out - ref)))

    # --- single-layer path (no PReLU / dropout) ---
    params1, alpha1 = init_feedforward_params(key, in_feats, hidden, out_feats,
                                              n_layers=1)
    out1 = jax.block_until_ready(feedforward_net(x, params1, alpha1))
    ref1 = _reference(x, params1, alpha1)
    assert out1.shape == (N, out_feats)
    assert jnp.allclose(out1, ref1, atol=1e-3, rtol=1e-3), \
        float(jnp.max(jnp.abs(out1 - ref1)))

    print("KERNEL_OK")
</pallas_src>

<mosaic_0001>
module attributes {stable_mosaic.version = 11 : i64} {
  func.func @_ffn_fused_kernel(%arg0: i32, %arg1: memref<128x128xbf16, #tpu.memory_space<vmem>>, %arg2: memref<128x128xbf16, #tpu.memory_space<vmem>>, %arg3: memref<1x128xf32, #tpu.memory_space<vmem>>, %arg4: memref<128x128xbf16, #tpu.memory_space<vmem>>, %arg5: memref<1x128xf32, #tpu.memory_space<vmem>>, %arg6: memref<128x128xbf16, #tpu.memory_space<vmem>>, %arg7: memref<1x128xf32, #tpu.memory_space<vmem>>, %arg8: memref<1xf32, #tpu.memory_space<smem>>, %arg9: memref<128x128xf32, #tpu.memory_space<vmem>>) attributes {dimension_semantics = [#tpu.dimension_semantics<parallel>], iteration_bounds = array<i64: 1>, scalar_prefetch = 0 : i64, scratch_operands = 0 : i64, tpu.core_type = #tpu.core_type<tc>, window_params = [{transform_indices = @transform_0, window_bounds = array<i64: 128, 128>}, {pipeline_mode = #tpu.pipeline_mode<synchronous>, transform_indices = @transform_1, window_bounds = array<i64: 128, 128>}, {pipeline_mode = #tpu.pipeline_mode<synchronous>, transform_indices = @transform_2, window_bounds = array<i64: 1, 128>}, {pipeline_mode = #tpu.pipeline_mode<synchronous>, transform_indices = @transform_3, window_bounds = array<i64: 128, 128>}, {pipeline_mode = #tpu.pipeline_mode<synchronous>, transform_indices = @transform_4, window_bounds = array<i64: 1, 128>}, {pipeline_mode = #tpu.pipeline_mode<synchronous>, transform_indices = @transform_5, window_bounds = array<i64: 128, 128>}, {pipeline_mode = #tpu.pipeline_mode<synchronous>, transform_indices = @transform_6, window_bounds = array<i64: 1, 128>}, {transform_indices = @transform_7, window_bounds = array<i64: 1>}, {transform_indices = @transform_8, window_bounds = array<i64: 128, 128>}]} {
    %c0 = arith.constant 0 : index
    %0 = memref.load %arg8[%c0] : memref<1xf32, #tpu.memory_space<smem>>
    %c0_0 = arith.constant 0 : index
    %c0_1 = arith.constant 0 : index
    %1 = vector.load %arg1[%c0_0, %c0_1] : memref<128x128xbf16, #tpu.memory_space<vmem>>, vector<128x128xbf16>
    %c0_2 = arith.constant 0 : index
    %c0_3 = arith.constant 0 : index
    %2 = vector.load %arg2[%c0_2, %c0_3] : memref<128x128xbf16, #tpu.memory_space<vmem>>, vector<128x128xbf16>
    %cst = arith.constant dense<0.000000e+00> : vector<128x128xf32>
    %3 = tpu.matmul %1, %2, %cst {dimension_numbers = #tpu.dot_dimension_numbers<[1], [0], [0], [1], [0, 0, 1, 1], [], []>} : vector<128x128xbf16>, vector<128x128xbf16>, vector<128x128xf32> -> vector<128x128xf32>
    %c0_4 = arith.constant 0 : index
    %c0_5 = arith.constant 0 : index
    %4 = vector.load %arg3[%c0_4, %c0_5] : memref<1x128xf32, #tpu.memory_space<vmem>>, vector<1x128xf32>
    %5 = vector.broadcast %4 : vector<1x128xf32> to vector<128x128xf32>
    %6 = arith.addf %3, %5 : vector<128x128xf32>
    %cst_6 = arith.constant 0.000000e+00 : f32
    %7 = vector.broadcast %cst_6 : f32 to vector<128x128xf32>
    %8 = arith.cmpf ogt, %6, %7 : vector<128x128xf32>
    %9 = vector.broadcast %0 : f32 to vector<128x128xf32>
    %10 = arith.mulf %9, %6 : vector<128x128xf32>
    %11 = arith.select %8, %6, %10 : vector<128x128xi1>, vector<128x128xf32>
    %12 = arith.truncf %11 : vector<128x128xf32> to vector<128x128xbf16>
    %c0_7 = arith.constant 0 : index
    %c0_8 = arith.constant 0 : index
    %13 = vector.load %arg4[%c0_7, %c0_8] : memref<128x128xbf16, #tpu.memory_space<vmem>>, vector<128x128xbf16>
    %cst_9 = arith.constant dense<0.000000e+00> : vector<128x128xf32>
    %14 = tpu.matmul %12, %13, %cst_9 {dimension_numbers = #tpu.dot_dimension_numbers<[1], [0], [0], [1], [0, 0, 1, 1], [], []>} : vector<128x128xbf16>, vector<128x128xbf16>, vector<128x128xf32> -> vector<128x128xf32>
    %c0_10 = arith.constant 0 : index
    %c0_11 = arith.constant 0 : index
    %15 = vector.load %arg5[%c0_10, %c0_11] : memref<1x128xf32, #tpu.memory_space<vmem>>, vector<1x128xf32>
    %16 = vector.broadcast %15 : vector<1x128xf32> to vector<128x128xf32>
    %17 = arith.addf %14, %16 : vector<128x128xf32>
    %cst_12 = arith.constant 0.000000e+00 : f32
    %18 = vector.broadcast %cst_12 : f32 to vector<128x128xf32>
    %19 = arith.cmpf ogt, %17, %18 : vector<128x128xf32>
    %20 = vector.broadcast %0 : f32 to vector<128x128xf32>
    %21 = arith.mulf %20, %17 : vector<128x128xf32>
    %22 = arith.select %19, %17, %21 : vector<128x128xi1>, vector<128x128xf32>
    %23 = arith.truncf %22 : vector<128x128xf32> to vector<128x128xbf16>
    %c0_13 = arith.constant 0 : index
    %c0_14 = arith.constant 0 : index
    %24 = vector.load %arg6[%c0_13, %c0_14] : memref<128x128xbf16, #tpu.memory_space<vmem>>, vector<128x128xbf16>
    %cst_15 = arith.constant dense<0.000000e+00> : vector<128x128xf32>
    %25 = tpu.matmul %23, %24, %cst_15 {dimension_numbers = #tpu.dot_dimension_numbers<[1], [0], [0], [1], [0, 0, 1, 1], [], []>} : vector<128x128xbf16>, vector<128x128xbf16>, vector<128x128xf32> -> vector<128x128xf32>
    %c0_16 = arith.constant 0 : index
    %c0_17 = arith.constant 0 : index
    %26 = vector.load %arg7[%c0_16, %c0_17] : memref<1x128xf32, #tpu.memory_space<vmem>>, vector<1x128xf32>
    %27 = vector.broadcast %26 : vector<1x128xf32> to vector<128x128xf32>
    %28 = arith.addf %25, %27 : vector<128x128xf32>
    %c0_18 = arith.constant 0 : index
    %c0_19 = arith.constant 0 : index
    %29 = vector.load %arg9[%c0_18, %c0_19] : memref<128x128xf32, #tpu.memory_space<vmem>>, vector<128x128xf32>
    tpu.vector_store %arg9[%c0_18, %c0_19], %28 {strides = array<i32>} : memref<128x128xf32, #tpu.memory_space<vmem>>, vector<128x128xf32>,
    return
  }
  func.func @transform_0(%arg0: i32) -> (i32, i32) {
    %c0_i32 = arith.constant 0 : i32
    %c0_i32_0 = arith.constant 0 : i32
    return %arg0, %c0_i32 : i32, i32
  }
  func.func @transform_1(%arg0: i32) -> (i32, i32) {
    %c0_i32 = arith.constant 0 : i32
    %c0_i32_0 = arith.constant 0 : i32
    %c0_i32_1 = arith.constant 0 : i32
    return %c0_i32, %c0_i32_0 : i32, i32
  }
  func.func @transform_2(%arg0: i32) -> (i32, i32) {
    %c0_i32 = arith.constant 0 : i32
    %c0_i32_0 = arith.constant 0 : i32
    %c0_i32_1 = arith.constant 0 : i32
    return %c0_i32, %c0_i32_0 : i32, i32
  }
  func.func @transform_3(%arg0: i32) -> (i32, i32) {
    %c0_i32 = arith.constant 0 : i32
    %c0_i32_0 = arith.constant 0 : i32
    %c0_i32_1 = arith.constant 0 : i32
    return %c0_i32, %c0_i32_0 : i32, i32
  }
  func.func @transform_4(%arg0: i32) -> (i32, i32) {
    %c0_i32 = arith.constant 0 : i32
    %c0_i32_0 = arith.constant 0 : i32
    %c0_i32_1 = arith.constant 0 : i32
    return %c0_i32, %c0_i32_0 : i32, i32
  }
  func.func @transform_5(%arg0: i32) -> (i32, i32) {
    %c0_i32 = arith.constant 0 : i32
    %c0_i32_0 = arith.constant 0 : i32
    %c0_i32_1 = arith.constant 0 : i32
    return %c0_i32, %c0_i32_0 : i32, i32
  }
  func.func @transform_6(%arg0: i32) -> (i32, i32) {
    %c0_i32 = arith.constant 0 : i32
    %c0_i32_0 = arith.constant 0 : i32
    %c0_i32_1 = arith.constant 0 : i32
    return %c0_i32, %c0_i32_0 : i32, i32
  }
  func.func @transform_7(%arg0: i32) -> i32 {
    %c0_i32 = arith.constant 0 : i32
    %c0_i32_0 = arith.constant 0 : i32
    return %c0_i32 : i32
  }
  func.func @transform_8(%arg0: i32) -> (i32, i32) {
    %c0_i32 = arith.constant 0 : i32
    %c0_i32_0 = arith.constant 0 : i32
    return %arg0, %c0_i32 : i32, i32
  }
}

</mosaic_0001>

<bundles_post_ra>
// kernel: tpu_custom_call.1
= control target key start
LH: loop header
LB: loop body
LE: loop exit
PB: predicated region body
PF: predicated region fallthrough
CT: control target
= control target key end

     0   :  { %14 = vsyncpa [#allocation4], 0  ;;  %s1335_s0 = inlined_call_operand.hbm [shape: bf16[128,128], index: 0, kind: input, shape index: {}]   ;;  %s1336_s1 = inlined_call_operand.hbm [shape: bf16[128,128], index: 1, kind: input, shape index: {}]   ;;  %s1337_s2 = inlined_call_operand.vmem [shape: f32[1,128], index: 2, kind: input, shape index: {}]   ;;  %s1338_s3 = inlined_call_operand.hbm [shape: bf16[128,128], index: 3, kind: input, shape index: {}]   ;;  %s1339_s4 = inlined_call_operand.vmem [shape: f32[1,128], index: 4, kind: input, shape index: {}]   ;;  %s1340_s5 = inlined_call_operand.hbm [shape: bf16[128,128], index: 5, kind: input, shape index: {}]   ;;  %s1341_s6 = inlined_call_operand.vmem [shape: f32[1,128], index: 6, kind: input, shape index: {}]   ;;  %s1342_s7 = inlined_call_operand.<no memory space> [shape: f32[1], index: 7, kind: input, shape index: {}]   ;;  %s1343_s8 = inlined_call_operand.hbm [shape: f32[128,128], index: 8, kind: output, shape index: {}]  }
   0x1   :  { %15 = vsyncpa [#allocation7], 0 }
   0x2   :  { %16 = vsyncpa [#allocation10], 0 }
   0x3   :  { %17 = vsyncpa [#allocation5], 0  ;;  %s1148_s27 = smov [#allocation6]   ;;  %s1149_s29 = smov [#allocation3]  }
   0x4   :  { %s35_s28 = sshll.u32 %s1148_s27, 4  ;;  %s23_s30 = sshll.u32 %s1149_s29, 4  ;;  %s36_s28 = int_to_ptr.vmem [resolvable:$true] %s35_s28  ;;  %s24_s30 = int_to_ptr.vmem [resolvable:$true] %s23_s30 }
   0x5   :  { %s1048_s9 = scalar_lea.vmem %s36_s28, 1024  ;;  %p1053_p1 = scmp.lt.s32.totalorder %s36_s28, %s36_s28 }
   0x6   :  { %p1049_p0 = scmp.ne.s32.totalorder %s36_s28, %s1048_s9  ;;  %p1054_p2 = scmp.lt.s32.totalorder %s1048_s9, %s1048_s9 }
   0x8   :  { %p1055_p3 = por %p1054_p2, %p1053_p1 }
   0xa   :  { %p1056_p4 = pnand %p1055_p3, %p1049_p0 }
   0xc   :  { %1059 = shalt.err (!%p1056_p4)
}
   0xd   :  { %s1150_s10 = smov 64   ;;  %s1151_s11 = smov 4  }
   0xe   :  { %41 = dma.hbm_to_vmem [thread:$0]  %s1336_s1, 1024, %s36_s28, [#allocation7], %s1150_s10, %s1150_s10, %s1151_s11  }
   0xf   :  { %s1068_s14 = scalar_lea.vmem %s24_s30, 1024  ;;  %p1073_p6 = scmp.lt.s32.totalorder %s24_s30, %s24_s30 }
  0x10   :  { %p1069_p5 = scmp.ne.s32.totalorder %s24_s30, %s1068_s14  ;;  %p1074_p7 = scmp.lt.s32.totalorder %s1068_s14, %s1068_s14 }
  0x12   :  { %p1075_p8 = por %p1074_p7, %p1073_p6 }
  0x14   :  { %p1076_p9 = pnand %p1075_p8, %p1069_p5 }
  0x16   :  { %1079 = shalt.err (!%p1076_p9)
}
  0x17   :  { %29 = dma.hbm_to_vmem [thread:$0]  %s1335_s0, 1024, %s24_s30, [#allocation4], %s1150_s10, %s1150_s10, %s1151_s11  }
  0x18   :  { %s1152_s17 = smov [#allocation8]   ;;  %s1153_s19 = smov [#allocation9]  }
  0x19   :  { %s49_s18 = sshll.u32 %s1152_s17, 4  ;;  %s63_s20 = sshll.u32 %s1153_s19, 4  ;;  %s50_s18 = int_to_ptr.vmem [resolvable:$true] %s49_s18  ;;  %s64_s20 = int_to_ptr.vmem [resolvable:$true] %s63_s20 }
  0x1a   :  { %s1088_s1 = scalar_lea.vmem %s50_s18, 1024  ;;  %p1093_p11 = scmp.lt.s32.totalorder %s50_s18, %s50_s18 }
  0x1b   :  { %p1089_p10 = scmp.ne.s32.totalorder %s50_s18, %s1088_s1  ;;  %p1094_p12 = scmp.lt.s32.totalorder %s1088_s1, %s1088_s1 }
  0x1d   :  { %p1095_p13 = por %p1094_p12, %p1093_p11 }
  0x1f   :  { %p1096_p0 = pnand %p1095_p13, %p1089_p10 }
  0x21   :  { %1099 = shalt.err (!%p1096_p0)
}
  0x22   :  { %55 = dma.hbm_to_vmem [thread:$0]  %s1338_s3, 1024, %s50_s18, [#allocation7], %s1150_s10, %s1150_s10, %s1151_s11  }
  0x23   :  { %s1108_s0 = scalar_lea.vmem %s64_s20, 1024  ;;  %p1113_p2 = scmp.lt.s32.totalorder %s64_s20, %s64_s20 }
  0x24   :  { %p1109_p1 = scmp.ne.s32.totalorder %s64_s20, %s1108_s0  ;;  %p1114_p3 = scmp.lt.s32.totalorder %s1108_s0, %s1108_s0 }
  0x26   :  { %p1115_p4 = por %p1114_p3, %p1113_p2 }
  0x28   :  { %p1116_p5 = pnand %p1115_p4, %p1109_p1 }
  0x2a   :  { %1119 = shalt.err (!%p1116_p5)
}
  0x2b   :  { %69 = dma.hbm_to_vmem [thread:$0]  %s1340_s5, 1024, %s64_s20, [#allocation10], %s1150_s10, %s1150_s10, %s1151_s11  }
  0x2c   :  { %1140 = dma.done.wait [#allocation4], 1024  }
  0x2d   :  { %1141 = vsyncadd [#allocation4], 4294966272 }
  0x2e   :  { %1142 = dma.done.wait [#allocation7], 2048  }
  0x2f   :  { %1143 = vsyncadd [#allocation7], 4294965248 }
  0x30   :  { %1144 = dma.done.wait [#allocation10], 1024  }
  0x31   :  { %1145 = vsyncadd [#allocation10], 4294966272  ;;  %v1008_v0 = vld [vmem:[#allocation6 + $0x38] sm:$0xff]   ;;  %v1009_v1 = vld [vmem:[#allocation6 + $0x30] sm:$0xff]   ;;  %v1252_v35 = vstv %s1342_s7 }
  0x32   :  { %887 = vmatprep.subr.bf16.mxu0 %v1008_v0  ;;  %v1010_v2 = vld [vmem:[#allocation6 + $0x28] sm:$0xff]   ;;  %v1011_v3 = vld [vmem:[#allocation6 + $0x20] sm:$0xff]   ;;  %v1012_v5 = vld [vmem:[#allocation6 + $0x18] sm:$0xff]  }
  0x33   :  { %888 = vmatpush3.bf16.msra.mxu0 %v1008_v0  ;;  %v1016_v4 = vld [vmem:[#allocation3] sm:$0xff]   ;;  %v1013_v6 = vld [vmem:[#allocation6 + $0x10] sm:$0xff]   ;;  %v1024_v7 = vld [vmem:[#allocation8 + $0x38] sm:$0xff]  }
  0x34   :  { %889 = vmatprep.subr.bf16.mxu0 %v1009_v1  ;;  %903 = vmatprep.mubr.bf16.mxu0 %v1016_v4  ;;  %v1025_v8 = vld [vmem:[#allocation8 + $0x30] sm:$0xff]   ;;  %v1014_v9 = vld [vmem:[#allocation6 + $0x8] sm:$0xff]   ;;  %v1015_v11 = vld [vmem:[#allocation6] sm:$0xff]  }
  0x35   :  { %919 = vmatprep.subr.bf16.mxu1 %v1024_v7  ;;  %v1026_v10 = vld [vmem:[#allocation8 + $0x28] sm:$0xff]   ;;  %v1027_v12 = vld [vmem:[#allocation8 + $0x20] sm:$0xff]   ;;  %v1028_v13 = vld [vmem:[#allocation8 + $0x18] sm:$0xff]  }
  0x36   :  { %920 = vmatpush3.bf16.msra.mxu1 %v1024_v7  ;;  %v1017_v14 = vld [vmem:[#allocation3 + $0x8] sm:$0xff]   ;;  %v1018_v15 = vld [vmem:[#allocation3 + $0x10] sm:$0xff]   ;;  %v1019_v16 = vld [vmem:[#allocation3 + $0x18] sm:$0xff]  }
  0x37   :  { %890 = vmatpush3.bf16.msra.mxu0 %v1009_v1  ;;  %921 = vmatprep.subr.bf16.mxu1 %v1025_v8  ;;  %v1020_v17 = vld [vmem:[#allocation3 + $0x20] sm:$0xff]   ;;  %v1021_v18 = vld [vmem:[#allocation3 + $0x28] sm:$0xff]   ;;  %v1022_v19 = vld [vmem:[#allocation3 + $0x30] sm:$0xff]  }
  0x38   :  { %891 = vmatprep.subr.bf16.mxu0 %v1010_v2  ;;  %v1023_v20 = vld [vmem:[#allocation3 + $0x38] sm:$0xff]   ;;  %v1029_v21 = vld [vmem:[#allocation8 + $0x10] sm:$0xff]   ;;  %v1030_v22 = vld [vmem:[#allocation8 + $0x8] sm:$0xff]  }
  0x39   :  { %v1031_v23 = vld [vmem:[#allocation8] sm:$0xff]   ;;  %v1032_v24 = vld [vmem:[#allocation9 + $0x38] sm:$0xff]   ;;  %v1226_v25 = vld [vmem:[#allocation9 + $0x30] sm:$0xff]  }
  0x3a   :  { %922 = vmatpush3.bf16.msra.mxu1 %v1025_v8  ;;  %v1229_v26 = vld [vmem:[#allocation9 + $0x28] sm:$0xff]   ;;  %v1233_v27 = vld [vmem:[#allocation9 + $0x20] sm:$0xff]   ;;  %v1237_v28 = vld [vmem:[#allocation9 + $0x18] sm:$0xff]  }
  0x3b   :  { %892 = vmatpush3.bf16.msra.mxu0 %v1010_v2  ;;  %923 = vmatprep.subr.bf16.mxu1 %v1026_v10  ;;  %v1245_v30 = vld [vmem:[%s1337_s2] ss:$0 sm:$0xff] }
  0x3c   :  { %893 = vmatprep.subr.bf16.mxu0 %v1011_v3 }
  0x3e   :  { %924 = vmatpush3.bf16.msra.mxu1 %v1026_v10 }
  0x3f   :  { %894 = vmatpush3.bf16.msra.mxu0 %v1011_v3  ;;  %925 = vmatprep.subr.bf16.mxu1 %v1027_v12 }
  0x40   :  { %895 = vmatprep.subr.bf16.mxu0 %v1012_v5 }
  0x42   :  { %926 = vmatpush3.bf16.msra.mxu1 %v1027_v12 }
  0x43   :  { %896 = vmatpush3.bf16.msra.mxu0 %v1012_v5  ;;  %927 = vmatprep.subr.bf16.mxu1 %v1028_v13 }
  0x44   :  { %897 = vmatprep.subr.bf16.mxu0 %v1013_v6 }
  0x46   :  { %928 = vmatpush3.bf16.msra.mxu1 %v1028_v13 }
  0x47   :  { %898 = vmatpush3.bf16.msra.mxu0 %v1013_v6  ;;  %929 = vmatprep.subr.bf16.mxu1 %v1029_v21 }
  0x48   :  { %899 = vmatprep.subr.bf16.mxu0 %v1014_v9 }
  0x4a   :  { %930 = vmatpush3.bf16.msra.mxu1 %v1029_v21 }
  0x4b   :  { %900 = vmatpush3.bf16.msra.mxu0 %v1014_v9  ;;  %931 = vmatprep.subr.bf16.mxu1 %v1030_v22 }
  0x4c   :  { %901 = vmatprep.subr.bf16.mxu0 %v1015_v11 }
  0x4e   :  { %932 = vmatpush3.bf16.msra.mxu1 %v1030_v22 }
  0x4f   :  { %902 = vmatpush3.bf16.msra.mxu0 %v1015_v11  ;;  %933 = vmatprep.subr.bf16.mxu1 %v1031_v23 }
  0x50   :  { %951 = vmatprep.subr.bf16.mxu0 %v1032_v24 }
  0x52   :  { %904 = vmatmul.mubr.bf16.vlgmr.msra.gmra.mxu0 %v1017_v14  ;;  %934 = vmatpush3.bf16.msra.mxu1 %v1031_v23 }
  0x53   :  { %907 = vmatprep.mubr.bf16.mxu0 %v1018_v15  ;;  %983 = vmatprep.subr.bf16.mxu1 %v1032_v24 }
  0x54   :  { %952 = vmatpush3.bf16.msra.mxu0 %v1032_v24 }
  0x55   :  { %953 = vmatprep.subr.bf16.mxu0 %v1226_v25 }
  0x58   :  { %954 = vmatpush3.bf16.msra.mxu0 %v1226_v25 }
  0x59   :  { %955 = vmatprep.subr.bf16.mxu0 %v1229_v26 }
  0x5a   :  { %908 = vmatmul.mubr.bf16.gmra.mxu0 %v1019_v16 }
  0x5b   :  { %911 = vmatprep.mubr.bf16.mxu0 %v1020_v17 }
  0x5c   :  { %956 = vmatpush3.bf16.msra.mxu0 %v1229_v26 }
  0x5d   :  { %957 = vmatprep.subr.bf16.mxu0 %v1233_v27 }
  0x60   :  { %958 = vmatpush3.bf16.msra.mxu0 %v1233_v27 }
  0x61   :  { %959 = vmatprep.subr.bf16.mxu0 %v1237_v28 }
  0x62   :  { %912 = vmatmul.mubr.bf16.gmra.mxu0 %v1021_v18 }
  0x63   :  { %915 = vmatprep.mubr.bf16.mxu0 %v1022_v19 }
  0x64   :  { %960 = vmatpush3.bf16.msra.mxu0 %v1237_v28 }
  0x6a   :  { %916 = vmatmul.mubr.bf16.gmra.mxu0 %v1023_v20 }
 0x112   :  { %v905_v29 = vpop.f32.mrf.mxu0 }
 0x113   :  { %v266_v33 = vadd.f32 %v905_v29, %v1245_v30 }
 0x114   :  { %v257_v31 = vpop.f32.mrf.mxu0 }
 0x115   :  { %v258_v32 = vadd.f32 %v1245_v30, %v257_v31  ;;  %v339_v41 = vmul.f32 %v1252_v35, %v266_v33  ;;  %vm322_vm2 = vcmp.gt.f32.partialorder %v266_v33, 0.0 }
 0x116   :  { %v906_v34 = vpop.f32.mrf.mxu0 }
 0x117   :  { %v269_v36 = vadd.f32 %v906_v34, %v1245_v30  ;;  %v337_v38 = vmul.f32 %v1252_v35, %v258_v32  ;;  %vm320_vm1 = vcmp.gt.f32.partialorder %v258_v32, 0.0  ;;  %v355_v52 = vsel %vm322_vm2, %v266_v33, %v339_v41 }
 0x118   :  { %v260_v37 = vpop.f32.mrf.mxu0 }
 0x119   :  { %vm323_vm0 = vcmp.gt.f32.partialorder %v269_v36, 0.0  ;;  %v340_v39 = vmul.f32 %v1252_v35, %v269_v36  ;;  %v261_v40 = vadd.f32 %v1245_v30, %v260_v37  ;;  %v353_v47 = vsel %vm320_vm1, %v258_v32, %v337_v38 }
 0x11a   :  { %v909_v42 = vpop.f32.mrf.mxu0 }
 0x11b   :  { %v338_v43 = vmul.f32 %v1252_v35, %v261_v40  ;;  %vm321_vm3 = vcmp.gt.f32.partialorder %v261_v40, 0.0  ;;  %v356_v45 = vsel %vm323_vm0, %v269_v36, %v340_v39  ;;  %v282_v49 = vadd.f32 %v909_v42, %v1245_v30  ;;  %v1037_v42 = vld [vmem:[#allocation9 + $0x10] sm:$0xff]  }
 0x11c   :  { %v273_v44 = vpop.f32.mrf.mxu0  ;;  %v370_v54 = vpack.c.bf16 %v356_v45, %v355_v52  ;;  %961 = vmatprep.subr.bf16.mxu0 %v1037_v42 }
 0x11d   :  { %v274_v46 = vadd.f32 %v1245_v30, %v273_v44  ;;  %v354_v48 = vsel %vm321_vm3, %v261_v40, %v338_v43  ;;  %v343_v59 = vmul.f32 %v1252_v35, %v282_v49  ;;  %vm326_vm6 = vcmp.gt.f32.partialorder %v282_v49, 0.0  ;;  %962 = vmatpush3.bf16.msra.mxu0 %v1037_v42  ;;  %v1295_v44 = vld [vmem:[%s1339_s4] ss:$0 sm:$0xff] }
 0x11e   :  { %v910_v50 = vpop.f32.mrf.mxu0  ;;  %v369_v51 = vpack.c.bf16 %v354_v48, %v353_v47 }
 0x11f   :  { %v285_v53 = vadd.f32 %v910_v50, %v1245_v30  ;;  %v341_v56 = vmul.f32 %v1252_v35, %v274_v46  ;;  %vm324_vm5 = vcmp.gt.f32.partialorder %v274_v46, 0.0  ;;  %v359_v6 = vsel %vm326_vm6, %v282_v49, %v343_v59 }
 0x120   :  { %v276_v55 = vpop.f32.mrf.mxu0  ;;  %935 = vmatprep.mubr.bf16.mxu1 %v369_v51 }
 0x121   :  { %vm327_vm4 = vcmp.gt.f32.partialorder %v285_v53, 0.0  ;;  %v344_v57 = vmul.f32 %v1252_v35, %v285_v53  ;;  %v277_v58 = vadd.f32 %v1245_v30, %v276_v55  ;;  %936 = vmatmul.mubr.bf16.vlgmr.msra.gmra.mxu1 %v370_v54  ;;  %v357_v1 = vsel %vm324_vm5, %v274_v46, %v341_v56 }
 0x122   :  { %v913_v60 = vpop.f32.mrf.mxu0  ;;  %991 = vmatpush3.bf16.msra.mxu1 %v1032_v24 }
 0x123   :  { %vm325_vm7 = vcmp.gt.f32.partialorder %v277_v58, 0.0  ;;  %v342_v61 = vmul.f32 %v1252_v35, %v277_v58  ;;  %984 = vmatprep.subr.bf16.mxu1 %v1226_v25  ;;  %v360_v63 = vsel %vm327_vm4, %v285_v53, %v344_v57  ;;  %v298_v3 = vadd.f32 %v913_v60, %v1245_v30 }
 0x124   :  { %v289_v62 = vpop.f32.mrf.mxu0  ;;  %v372_v8 = vpack.c.bf16 %v360_v63, %v359_v6 }
 0x125   :  { %v290_v0 = vadd.f32 %v1245_v30, %v289_v62  ;;  %v358_v2 = vsel %vm325_vm7, %v277_v58, %v342_v61  ;;  %v347_v13 = vmul.f32 %v1252_v35, %v298_v3  ;;  %vm330_vm10 = vcmp.gt.f32.partialorder %v298_v3, 0.0 }
 0x126   :  { %v914_v4 = vpop.f32.mrf.mxu0  ;;  %v371_v5 = vpack.c.bf16 %v358_v2, %v357_v1  ;;  %992 = vmatpush3.bf16.msra.mxu1 %v1226_v25 }
 0x127   :  { %v301_v7 = vadd.f32 %v914_v4, %v1245_v30  ;;  %985 = vmatprep.subr.bf16.mxu1 %v1229_v26  ;;  %v345_v10 = vmul.f32 %v1252_v35, %v290_v0  ;;  %vm328_vm9 = vcmp.gt.f32.partialorder %v290_v0, 0.0  ;;  %v363_v24 = vsel %vm330_vm10, %v298_v3, %v347_v13 }
 0x128   :  { %v292_v9 = vpop.f32.mrf.mxu0  ;;  %939 = vmatprep.mubr.bf16.mxu1 %v371_v5 }
 0x129   :  { %vm331_vm8 = vcmp.gt.f32.partialorder %v301_v7, 0.0  ;;  %v348_v11 = vmul.f32 %v1252_v35, %v301_v7  ;;  %v293_v12 = vadd.f32 %v1245_v30, %v292_v9  ;;  %940 = vmatmul.mubr.bf16.gmra.mxu1 %v372_v8  ;;  %v361_v19 = vsel %vm328_vm9, %v290_v0, %v345_v10 }
 0x12a   :  { %v917_v14 = vpop.f32.mrf.mxu0  ;;  %993 = vmatpush3.bf16.msra.mxu1 %v1229_v26 }
 0x12b   :  { %vm329_vm11 = vcmp.gt.f32.partialorder %v293_v12, 0.0  ;;  %v346_v15 = vmul.f32 %v1252_v35, %v293_v12  ;;  %986 = vmatprep.subr.bf16.mxu1 %v1233_v27  ;;  %v364_v17 = vsel %vm331_vm8, %v301_v7, %v348_v11  ;;  %v314_v21 = vadd.f32 %v917_v14, %v1245_v30 }
 0x12c   :  { %v305_v16 = vpop.f32.mrf.mxu0  ;;  %v374_v26 = vpack.c.bf16 %v364_v17, %v363_v24 }
 0x12d   :  { %v306_v18 = vadd.f32 %v1245_v30, %v305_v16  ;;  %v362_v20 = vsel %vm329_vm11, %v293_v12, %v346_v15  ;;  %v351_v34 = vmul.f32 %v1252_v35, %v314_v21  ;;  %vm334_vm14 = vcmp.gt.f32.partialorder %v314_v21, 0.0 }
 0x12e   :  { %v918_v22 = vpop.f32.mrf.mxu0  ;;  %v373_v23 = vpack.c.bf16 %v362_v20, %v361_v19  ;;  %994 = vmatpush3.bf16.msra.mxu1 %v1233_v27 }
 0x12f   :  { %v317_v25 = vadd.f32 %v918_v22, %v1245_v30  ;;  %987 = vmatprep.subr.bf16.mxu1 %v1237_v28  ;;  %v349_v31 = vmul.f32 %v1252_v35, %v306_v18  ;;  %vm332_vm13 = vcmp.gt.f32.partialorder %v306_v18, 0.0  ;;  %v367_v40 = vsel %vm334_vm14, %v314_v21, %v351_v34 }
 0x130   :  { %v308_v29 = vpop.f32.mrf.mxu0  ;;  %943 = vmatprep.mubr.bf16.mxu1 %v373_v23 }
 0x131   :  { %vm335_vm12 = vcmp.gt.f32.partialorder %v317_v25, 0.0  ;;  %v352_v32 = vmul.f32 %v1252_v35, %v317_v25  ;;  %v309_v33 = vadd.f32 %v1245_v30, %v308_v29  ;;  %944 = vmatmul.mubr.bf16.gmra.mxu1 %v374_v26  ;;  %v365_v37 = vsel %vm332_vm13, %v306_v18, %v349_v31  ;;  %v1038_v30 = vld [vmem:[#allocation9 + $0x8] sm:$0xff]  }
 0x132   :  { %995 = vmatpush3.bf16.msra.mxu1 %v1237_v28  ;;  %963 = vmatprep.subr.bf16.mxu0 %v1038_v30  ;;  %v1039_v28 = vld [vmem:[#allocation9] sm:$0xff]  }
 0x133   :  { %vm333_vm15 = vcmp.gt.f32.partialorder %v309_v33, 0.0  ;;  %v350_v27 = vmul.f32 %v1252_v35, %v309_v33  ;;  %v368_v36 = vsel %vm335_vm12, %v317_v25, %v352_v32  ;;  %988 = vmatprep.subr.bf16.mxu1 %v1037_v42  ;;  %964 = vmatpush3.bf16.msra.mxu0 %v1038_v30 }
 0x134   :  { %v376_v41 = vpack.c.bf16 %v368_v36, %v367_v40  ;;  %965 = vmatprep.subr.bf16.mxu0 %v1039_v28 }
 0x135   :  { %v366_v38 = vsel %vm333_vm15, %v309_v33, %v350_v27 }
 0x136   :  { %v375_v39 = vpack.c.bf16 %v366_v38, %v365_v37  ;;  %996 = vmatpush3.bf16.msra.mxu1 %v1037_v42 }
 0x137   :  { %989 = vmatprep.subr.bf16.mxu1 %v1038_v30  ;;  %966 = vmatpush3.bf16.msra.mxu0 %v1039_v28 }
 0x138   :  { %947 = vmatprep.mubr.bf16.mxu1 %v375_v39 }
 0x139   :  { %948 = vmatmul.mubr.bf16.gmra.mxu1 %v376_v41 }
 0x13a   :  { %997 = vmatpush3.bf16.msra.mxu1 %v1038_v30 }
 0x13b   :  { %990 = vmatprep.subr.bf16.mxu1 %v1039_v28 }
 0x13e   :  { %998 = vmatpush3.bf16.msra.mxu1 %v1039_v28 }
 0x1e1   :  { %v937_v43 = vpop.f32.mrf.mxu1 }
 0x1e2   :  { %v491_v47 = vadd.f32 %v937_v43, %v1295_v44 }
 0x1e3   :  { %v482_v45 = vpop.f32.mrf.mxu1 }
 0x1e4   :  { %v483_v46 = vadd.f32 %v1295_v44, %v482_v45  ;;  %v563_v54 = vmul.f32 %v491_v47, %v1252_v35  ;;  %vm547_vm2 = vcmp.gt.f32.partialorder %v491_v47, 0.0 }
 0x1e5   :  { %v938_v48 = vpop.f32.mrf.mxu1 }
 0x1e6   :  { %v494_v49 = vadd.f32 %v938_v48, %v1295_v44  ;;  %v561_v51 = vmul.f32 %v483_v46, %v1252_v35  ;;  %vm545_vm1 = vcmp.gt.f32.partialorder %v483_v46, 0.0  ;;  %v579_v62 = vsel %vm547_vm2, %v491_v47, %v563_v54 }
 0x1e7   :  { %v485_v50 = vpop.f32.mrf.mxu1 }
 0x1e8   :  { %vm548_vm0 = vcmp.gt.f32.partialorder %v494_v49, 0.0  ;;  %v564_v52 = vmul.f32 %v494_v49, %v1252_v35  ;;  %v486_v53 = vadd.f32 %v1295_v44, %v485_v50  ;;  %v577_v60 = vsel %vm545_vm1, %v483_v46, %v561_v51 }
 0x1e9   :  { %v941_v55 = vpop.f32.mrf.mxu1 }
 0x1ea   :  { %vm546_vm3 = vcmp.gt.f32.partialorder %v486_v53, 0.0  ;;  %v562_v56 = vmul.f32 %v486_v53, %v1252_v35  ;;  %v580_v57 = vsel %vm548_vm0, %v494_v49, %v564_v52  ;;  %v507_v63 = vadd.f32 %v941_v55, %v1295_v44 }
 0x1eb   :  { %v498_v58 = vpop.f32.mrf.mxu1  ;;  %v594_v2 = vpack.c.bf16 %v580_v57, %v579_v62 }
 0x1ec   :  { %v499_v59 = vadd.f32 %v1295_v44, %v498_v58  ;;  %v578_v61 = vsel %vm546_vm3, %v486_v53, %v562_v56  ;;  %v567_v8 = vmul.f32 %v507_v63, %v1252_v35  ;;  %vm551_vm6 = vcmp.gt.f32.partialorder %v507_v63, 0.0 }
 0x1ed   :  { %v942_v0 = vpop.f32.mrf.mxu1  ;;  %v593_v1 = vpack.c.bf16 %v578_v61, %v577_v60 }
 0x1ee   :  { %v510_v3 = vadd.f32 %v942_v0, %v1295_v44  ;;  %v565_v5 = vmul.f32 %v499_v59, %v1252_v35  ;;  %vm549_vm5 = vcmp.gt.f32.partialorder %v499_v59, 0.0  ;;  %v583_v19 = vsel %vm551_vm6, %v507_v63, %v567_v8 }
 0x1ef   :  { %v501_v4 = vpop.f32.mrf.mxu1  ;;  %967 = vmatprep.mubr.bf16.mxu0 %v593_v1 }
 0x1f0   :  { %vm552_vm4 = vcmp.gt.f32.partialorder %v510_v3, 0.0  ;;  %v568_v6 = vmul.f32 %v510_v3, %v1252_v35  ;;  %v502_v7 = vadd.f32 %v1295_v44, %v501_v4  ;;  %968 = vmatmul.mubr.bf16.vlgmr.msra.gmra.mxu0 %v594_v2  ;;  %v581_v14 = vsel %vm549_vm5, %v499_v59, %v565_v5 }
 0x1f1   :  { %v945_v9 = vpop.f32.mrf.mxu1 }
 0x1f2   :  { %vm550_vm7 = vcmp.gt.f32.partialorder %v502_v7, 0.0  ;;  %v566_v10 = vmul.f32 %v502_v7, %v1252_v35  ;;  %v584_v12 = vsel %vm552_vm4, %v510_v3, %v568_v6  ;;  %v523_v16 = vadd.f32 %v945_v9, %v1295_v44 }
 0x1f3   :  { %v514_v11 = vpop.f32.mrf.mxu1  ;;  %v596_v21 = vpack.c.bf16 %v584_v12, %v583_v19 }
 0x1f4   :  { %v515_v13 = vadd.f32 %v1295_v44, %v514_v11  ;;  %v582_v15 = vsel %vm550_vm7, %v502_v7, %v566_v10  ;;  %v571_v26 = vmul.f32 %v523_v16, %v1252_v35  ;;  %vm555_vm10 = vcmp.gt.f32.partialorder %v523_v16, 0.0 }
 0x1f5   :  { %v946_v17 = vpop.f32.mrf.mxu1  ;;  %v595_v18 = vpack.c.bf16 %v582_v15, %v581_v14 }
 0x1f6   :  { %v526_v20 = vadd.f32 %v946_v17, %v1295_v44  ;;  %v569_v23 = vmul.f32 %v515_v13, %v1252_v35  ;;  %vm553_vm9 = vcmp.gt.f32.partialorder %v515_v13, 0.0  ;;  %v587_v37 = vsel %vm555_vm10, %v523_v16, %v571_v26 }
 0x1f7   :  { %v517_v22 = vpop.f32.mrf.mxu1  ;;  %971 = vmatprep.mubr.bf16.mxu0 %v595_v18 }
 0x1f8   :  { %vm556_vm8 = vcmp.gt.f32.partialorder %v526_v20, 0.0  ;;  %v572_v24 = vmul.f32 %v526_v20, %v1252_v35  ;;  %v518_v25 = vadd.f32 %v1295_v44, %v517_v22  ;;  %972 = vmatmul.mubr.bf16.gmra.mxu0 %v596_v21  ;;  %v585_v27 = vsel %vm553_vm9, %v515_v13, %v569_v23 }
 0x1f9   :  { %v949_v29 = vpop.f32.mrf.mxu1 }
 0x1fa   :  { %vm554_vm11 = vcmp.gt.f32.partialorder %v518_v25, 0.0  ;;  %v570_v31 = vmul.f32 %v518_v25, %v1252_v35  ;;  %v588_v32 = vsel %vm556_vm8, %v526_v20, %v572_v24  ;;  %v539_v38 = vadd.f32 %v949_v29, %v1295_v44 }
 0x1fb   :  { %v530_v33 = vpop.f32.mrf.mxu1  ;;  %v598_v41 = vpack.c.bf16 %v588_v32, %v587_v37 }
 0x1fc   :  { %v531_v34 = vadd.f32 %v1295_v44, %v530_v33  ;;  %v586_v36 = vsel %vm554_vm11, %v518_v25, %v570_v31  ;;  %v575_v46 = vmul.f32 %v539_v38, %v1252_v35  ;;  %vm559_vm14 = vcmp.gt.f32.partialorder %v539_v38, 0.0 }
 0x1fd   :  { %v950_v39 = vpop.f32.mrf.mxu1  ;;  %v597_v40 = vpack.c.bf16 %v586_v36, %v585_v27 }
 0x1fe   :  { %v542_v42 = vadd.f32 %v950_v39, %v1295_v44  ;;  %v573_v28 = vmul.f32 %v531_v34, %v1252_v35  ;;  %vm557_vm13 = vcmp.gt.f32.partialorder %v531_v34, 0.0  ;;  %v591_v52 = vsel %vm559_vm14, %v539_v38, %v575_v46 }
 0x1ff   :  { %v533_v30 = vpop.f32.mrf.mxu1  ;;  %975 = vmatprep.mubr.bf16.mxu1 %v597_v40 }
 0x200   :  { %vm560_vm12 = vcmp.gt.f32.partialorder %v542_v42, 0.0  ;;  %v576_v43 = vmul.f32 %v542_v42, %v1252_v35  ;;  %v534_v45 = vadd.f32 %v1295_v44, %v533_v30  ;;  %976 = vmatmul.mubr.bf16.vlgmr.msra.gmra.mxu1 %v598_v41  ;;  %v589_v49 = vsel %vm557_vm13, %v531_v34, %v573_v28  ;;  %v830_v44 = vld [vmem:[%s1341_s6] ss:$0 sm:$0xff]  ;;  %s1154_s6 = smov [#allocation11]  }
 0x201   :  { %s790_s28 = sshll.u32 %s1154_s6, 4  ;;  %s791_s28 = int_to_ptr.vmem [resolvable:$true] %s790_s28 }
 0x202   :  { %vm558_vm15 = vcmp.gt.f32.partialorder %v534_v45, 0.0  ;;  %v574_v47 = vmul.f32 %v534_v45, %v1252_v35  ;;  %v592_v48 = vsel %vm560_vm12, %v542_v42, %v576_v43  ;;  %s1120_s29 = scalar_lea.vmem %s791_s28, 2048  ;;  %p1125_p7 = scmp.lt.s32.totalorder %s791_s28, %s791_s28 }
 0x203   :  { %v600_v53 = vpack.c.bf16 %v592_v48, %v591_v52  ;;  %p1121_p6 = scmp.ne.s32.totalorder %s791_s28, %s1120_s29  ;;  %p1126_p8 = scmp.lt.s32.totalorder %s1120_s29, %s1120_s29 }
 0x204   :  { %v590_v50 = vsel %vm558_vm15, %v534_v45, %v574_v47 }
 0x205   :  { %v599_v51 = vpack.c.bf16 %v590_v50, %v589_v49  ;;  %p1127_p9 = por %p1126_p8, %p1125_p7 }
 0x207   :  { %979 = vmatprep.mubr.bf16.mxu1 %v599_v51  ;;  %p1128_p10 = pnand %p1127_p9, %p1121_p6 }
 0x208   :  { %980 = vmatmul.mubr.bf16.gmra.mxu1 %v600_v53 }
 0x2b0   :  { %v969_v54 = vpop.f32.mrf.mxu0 }
 0x2b1   :  { %v715_v55 = vadd.f32 %v969_v54, %v830_v44 }
 0x2b2   :  { %v706_v56 = vpop.f32.mrf.mxu0 }
 0x2b3   :  { %771 = vst [vmem:[#allocation11 + $0x10] sm:$0xff] %v715_v55  ;;  %v707_v57 = vadd.f32 %v830_v44, %v706_v56 }
 0x2b4   :  { %v970_v58 = vpop.f32.mrf.mxu0 }
 0x2b5   :  { %769 = vst [vmem:[#allocation11] sm:$0xff] %v707_v57  ;;  %v718_v35 = vadd.f32 %v970_v58, %v830_v44 }
 0x2b6   :  { %v709_v59 = vpop.f32.mrf.mxu0 }
 0x2b7   :  { %772 = vst [vmem:[#allocation11 + $0x18] sm:$0xff] %v718_v35  ;;  %v710_v60 = vadd.f32 %v830_v44, %v709_v59 }
 0x2b8   :  { %v973_v61 = vpop.f32.mrf.mxu0 }
 0x2b9   :  { %770 = vst [vmem:[#allocation11 + $0x8] sm:$0xff] %v710_v60  ;;  %v731_v62 = vadd.f32 %v973_v61, %v830_v44 }
 0x2ba   :  { %v722_v63 = vpop.f32.mrf.mxu0 }
 0x2bb   :  { %775 = vst [vmem:[#allocation11 + $0x30] sm:$0xff] %v731_v62  ;;  %v723_v0 = vadd.f32 %v830_v44, %v722_v63 }
 0x2bc   :  { %v974_v1 = vpop.f32.mrf.mxu0 }
 0x2bd   :  { %773 = vst [vmem:[#allocation11 + $0x20] sm:$0xff] %v723_v0  ;;  %v734_v2 = vadd.f32 %v974_v1, %v830_v44 }
 0x2be   :  { %v725_v3 = vpop.f32.mrf.mxu0 }
 0x2bf   :  { %776 = vst [vmem:[#allocation11 + $0x38] sm:$0xff] %v734_v2  ;;  %v726_v4 = vadd.f32 %v830_v44, %v725_v3 }
 0x2c0   :  { %v977_v5 = vpop.f32.mrf.mxu1 }
 0x2c1   :  { %774 = vst [vmem:[#allocation11 + $0x28] sm:$0xff] %v726_v4  ;;  %v747_v6 = vadd.f32 %v977_v5, %v830_v44 }
 0x2c2   :  { %v738_v7 = vpop.f32.mrf.mxu1 }
 0x2c3   :  { %779 = vst [vmem:[#allocation11 + $0x50] sm:$0xff] %v747_v6  ;;  %v739_v8 = vadd.f32 %v830_v44, %v738_v7 }
 0x2c4   :  { %v978_v9 = vpop.f32.mrf.mxu1 }
 0x2c5   :  { %777 = vst [vmem:[#allocation11 + $0x40] sm:$0xff] %v739_v8  ;;  %v750_v10 = vadd.f32 %v978_v9, %v830_v44 }
 0x2c6   :  { %v741_v11 = vpop.f32.mrf.mxu1 }
 0x2c7   :  { %780 = vst [vmem:[#allocation11 + $0x58] sm:$0xff] %v750_v10  ;;  %v742_v12 = vadd.f32 %v830_v44, %v741_v11 }
 0x2c8   :  { %v981_v13 = vpop.f32.mrf.mxu1 }
 0x2c9   :  { %778 = vst [vmem:[#allocation11 + $0x48] sm:$0xff] %v742_v12  ;;  %v763_v14 = vadd.f32 %v981_v13, %v830_v44 }
 0x2ca   :  { %v754_v15 = vpop.f32.mrf.mxu1 }
 0x2cb   :  { %783 = vst [vmem:[#allocation11 + $0x70] sm:$0xff] %v763_v14  ;;  %v755_v16 = vadd.f32 %v830_v44, %v754_v15 }
 0x2cc   :  { %v982_v17 = vpop.f32.mrf.mxu1 }
 0x2cd   :  { %781 = vst [vmem:[#allocation11 + $0x60] sm:$0xff] %v755_v16  ;;  %v766_v18 = vadd.f32 %v982_v17, %v830_v44 }
 0x2ce   :  { %v757_v19 = vpop.f32.mrf.mxu1 }
 0x2cf   :  { %784 = vst [vmem:[#allocation11 + $0x78] sm:$0xff] %v766_v18  ;;  %v758_v20 = vadd.f32 %v830_v44, %v757_v19 }
 0x2d1   :  { %782 = vst [vmem:[#allocation11 + $0x68] sm:$0xff] %v758_v20 }
 0x2d2   :  { %1131 = shalt.err (!%p1128_p10)
}
 0x2d3   :  { %s1155_s30 = smov 128   ;;  %s1156_s9 = smov 8  }
 0x2d4   :  { %796 = dma.vmem_to_hbm [thread:$0]  %s791_s28, 2048, %s1343_s8, [#allocation5], %s1155_s30, %s1155_s30, %s1156_s9  }
 0x2d5   :  { %1146 = dma.done.wait [#allocation5], 2048  }
 0x2d6   :  { %1147 = vsyncadd [#allocation5], 4294965248 }
 0x2d7   :  { %800 = vsyncpa [#allocation4], 1 }
 0x2d8   :  { %801 = vsyncpa [#allocation7], 1 }
 0x2d9   :  { %802 = vsyncpa [#allocation10], 1 }
 0x2da   :  { %803 = vsyncpa [#allocation5], 1 }

</bundles_post_ra>
